<compile_context>
chip_gen: v5e
topology: v5e:2x2
jax: 0.10.0
libtpu: 0.0.40
codegen_flags: <defaults>
</compile_context>

<pallas_src>
import functools

import jax
import jax.numpy as jnp
from jax.experimental import pallas as pl
from jax.experimental.pallas import tpu as pltpu


def _round_up(x, m):
    return ((x + m - 1) // m) * m


def prepare_linearnet_params(w_first, b_first, w_enc, b_enc):
    """One-time (load-time) weight prep: pad descriptor dim to 128 lanes and
    cast matmul operands to bf16.  Padded lanes of every weight AND bias are
    zero, so padded columns of the running activation stay exactly zero through
    LeakyReLU / matmul / bias / residual (they are never written out anyway).

    w_first: (coeff_nc, D), b_first: (D,), w_enc: (layer, D, D), b_enc: (layer, D)
    (pre-transposed (in_features, out_features) vs torch.nn.Linear storage).
    """
    C, D = w_first.shape
    L = w_enc.shape[0]
    Dp = _round_up(D, 128)  # lane-dense MXU columns (e.g. descriptor_nc=256 stays 256)

    w0 = jnp.zeros((C, Dp), jnp.bfloat16).at[:, :D].set(w_first.astype(jnp.bfloat16))
    b0 = jnp.zeros((1, Dp), jnp.float32).at[:, :D].set(b_first.astype(jnp.float32))
    we = jnp.zeros((L, Dp, Dp), jnp.bfloat16).at[:, :D, :D].set(w_enc.astype(jnp.bfloat16))
    be = jnp.zeros((L, 1, Dp), jnp.float32).at[:, 0, :D].set(b_enc.astype(jnp.float32))
    return {"w0": w0, "b0": b0, "we": we, "be": be, "d_out": D}


def _linearnet_kernel(x_ref, w0_ref, b0_ref, we_ref, be_ref, out_ref, *, layer, d_out):
    # In-kernel bf16 cast of the x tile (free VPU work; saves a wrapper pass).
    x_bf = x_ref[...].astype(jnp.bfloat16)

    # First linear: (TB, C)bf16 @ (C, Dp)bf16 -> f32 accumulate, + f32 bias.
    out = jnp.dot(x_bf, w0_ref[...], preferred_element_type=jnp.float32)
    out = out + b0_ref[...]

    # Residual encoder blocks: out = Linear(LeakyReLU(out, 0.1)) + out
    for i in range(layer):  # static python loop; `layer` is small & compile-time
        h = jnp.where(out > 0, out, 0.1 * out)          # LeakyReLU(0.1), f32
        h_bf = h.astype(jnp.bfloat16)                   # cast only for the MXU
        out = (jnp.dot(h_bf, we_ref[i], preferred_element_type=jnp.float32)
               + be_ref[i] + out)

    # Write only the real descriptor columns (masked vst; halves write bytes vs
    # a padded 128-lane f32 slab and removes the post-kernel slice pass).
    out_ref[...] = out[:, :d_out].astype(out_ref.dtype)


def linearnet_forward(x, params, *, block_b=1024):
    """x: (B, coeff_nc) f32 (fed raw, no pre-pad/cast); params from
    prepare_linearnet_params.  Returns (B, descriptor_nc) f32."""
    B, C = x.shape
    w0, b0, we, be = params["w0"], params["b0"], params["we"], params["be"]
    D = params["d_out"]
    Dp = w0.shape[1]
    L = we.shape[0]

    # Batch tile: big enough to amortize the ~0.35us per-grid-step overhead,
    # small enough that the grid has >=2 steps so the "parallel" axis uses both
    # v7x TensorCores when B allows it.  Multiple of 8 (f32 sublane packing).
    TB = min(block_b, _round_up(-(-B // 2), 16))
    TB = max(8, min(TB, _round_up(B, 8)))
    grid = (pl.cdiv(B, TB),)  # partial last tile OK: rows are independent

    kernel = functools.partial(_linearnet_kernel, layer=L, d_out=D)

    return pl.pallas_call(
        kernel,
        out_shape=jax.ShapeDtypeStruct((B, D), jnp.float32),
        grid_spec=pl.GridSpec(
            grid=grid,
            in_specs=[
                pl.BlockSpec((TB, C), lambda i: (i, 0)),         # x tile per step
                pl.BlockSpec((C, Dp), lambda i: (0, 0)),         # weights: constant
                pl.BlockSpec((1, Dp), lambda i: (0, 0)),         #  index_maps ->
                pl.BlockSpec((L, Dp, Dp), lambda i: (0, 0, 0)),  #  VMEM-resident
                pl.BlockSpec((L, 1, Dp), lambda i: (0, 0, 0)),
            ],
            out_specs=pl.BlockSpec((TB, D), lambda i: (i, 0)),
        ),
        compiler_params=pltpu.CompilerParams(
            dimension_semantics=("parallel",)),  # shard batch tiles across TCs (v7x)
    )(x, w0, b0, we, be)


def _reference(x, w_first, b_first, w_enc, b_enc):
    out = x @ w_first + b_first
    for i in range(w_enc.shape[0]):
        h = jnp.where(out > 0, out, 0.1 * out)
        out = h @ w_enc[i] + b_enc[i] + out
    return out


if __name__ == "__main__":
    # Small shapes consistent with LinearNet(coeff_nc, descriptor_nc, layer).
    coeff_nc, descriptor_nc, layer = 32, 64, 3
    batch = 40   # not a multiple of the tile -> exercises the partial last tile

    key = jax.random.PRNGKey(0)
    k_x, k_w0, k_b0, k_we, k_be = jax.random.split(key, 5)

    x = jax.random.normal(k_x, (batch, coeff_nc), dtype=jnp.float32)
    # Weights stored pre-transposed: (in_features, out_features)
    w_first = jax.random.normal(k_w0, (coeff_nc, descriptor_nc), jnp.float32) * 0.1
    b_first = jax.random.normal(k_b0, (descriptor_nc,), jnp.float32) * 0.1
    w_enc = jax.random.normal(k_we, (layer, descriptor_nc, descriptor_nc), jnp.float32) * 0.1
    b_enc = jax.random.normal(k_be, (layer, descriptor_nc), jnp.float32) * 0.1

    # One-time weight prep (simulates model-load time; not per-forward work).
    params = prepare_linearnet_params(w_first, b_first, w_enc, b_enc)

    # Default block_b=1024; for this demo TB collapses to 32 -> grid=(2,) with
    # a partial (8-row) last tile, exercising the multi-step parallel batch axis.
    out = linearnet_forward(x, params)
    out = jax.block_until_ready(out)

    ref = _reference(x, w_first, b_first, w_enc, b_enc)
    assert out.shape == (batch, descriptor_nc)
    # bf16 matmul operands (f32 accumulate) -> loosened tolerance vs f32 reference.
    assert jnp.allclose(out, ref, atol=5e-2, rtol=5e-2), "mismatch vs reference"

    print("KERNEL_OK")
</pallas_src>

<mosaic_0001>
module attributes {stable_mosaic.version = 11 : i64} {
  func.func @_linearnet_kernel(%arg0: i32, %arg1: memref<32x32xf32, #tpu.memory_space<vmem>>, %arg2: memref<32x128xbf16, #tpu.memory_space<vmem>>, %arg3: memref<1x128xf32, #tpu.memory_space<vmem>>, %arg4: memref<3x128x128xbf16, #tpu.memory_space<vmem>>, %arg5: memref<3x1x128xf32, #tpu.memory_space<vmem>>, %arg6: memref<32x64xf32, #tpu.memory_space<vmem>>) attributes {dimension_semantics = [#tpu.dimension_semantics<parallel>], iteration_bounds = array<i64: 2>, scalar_prefetch = 0 : i64, scratch_operands = 0 : i64, tpu.core_type = #tpu.core_type<tc>, window_params = [{transform_indices = @transform_0, window_bounds = array<i64: 32, 32>}, {pipeline_mode = #tpu.pipeline_mode<synchronous>, transform_indices = @transform_1, window_bounds = array<i64: 32, 128>}, {pipeline_mode = #tpu.pipeline_mode<synchronous>, transform_indices = @transform_2, window_bounds = array<i64: 1, 128>}, {pipeline_mode = #tpu.pipeline_mode<synchronous>, transform_indices = @transform_3, window_bounds = array<i64: 3, 128, 128>}, {pipeline_mode = #tpu.pipeline_mode<synchronous>, transform_indices = @transform_4, window_bounds = array<i64: 3, 1, 128>}, {transform_indices = @transform_5, window_bounds = array<i64: 32, 64>}]} {
    %c0 = arith.constant 0 : index
    %c0_0 = arith.constant 0 : index
    %0 = vector.load %arg1[%c0, %c0_0] : memref<32x32xf32, #tpu.memory_space<vmem>>, vector<32x32xf32>
    %1 = arith.truncf %0 : vector<32x32xf32> to vector<32x32xbf16>
    %c0_1 = arith.constant 0 : index
    %c0_2 = arith.constant 0 : index
    %2 = vector.load %arg2[%c0_1, %c0_2] : memref<32x128xbf16, #tpu.memory_space<vmem>>, vector<32x128xbf16>
    %cst = arith.constant dense<0.000000e+00> : vector<32x128xf32>
    %3 = tpu.matmul %1, %2, %cst {dimension_numbers = #tpu.dot_dimension_numbers<[1], [0], [0], [1], [0, 0, 1, 1], [], []>} : vector<32x32xbf16>, vector<32x128xbf16>, vector<32x128xf32> -> vector<32x128xf32>
    %c0_3 = arith.constant 0 : index
    %c0_4 = arith.constant 0 : index
    %4 = vector.load %arg3[%c0_3, %c0_4] : memref<1x128xf32, #tpu.memory_space<vmem>>, vector<1x128xf32>
    %5 = vector.broadcast %4 : vector<1x128xf32> to vector<32x128xf32>
    %6 = arith.addf %3, %5 : vector<32x128xf32>
    %cst_5 = arith.constant 0.000000e+00 : f32
    %7 = vector.broadcast %cst_5 : f32 to vector<32x128xf32>
    %8 = arith.cmpf ogt, %6, %7 : vector<32x128xf32>
    %cst_6 = arith.constant 1.000000e-01 : f32
    %9 = vector.broadcast %cst_6 : f32 to vector<32x128xf32>
    %10 = arith.mulf %9, %6 : vector<32x128xf32>
    %11 = arith.select %8, %6, %10 : vector<32x128xi1>, vector<32x128xf32>
    %12 = arith.truncf %11 : vector<32x128xf32> to vector<32x128xbf16>
    %c0_7 = arith.constant 0 : index
    %c0_8 = arith.constant 0 : index
    %c0_9 = arith.constant 0 : index
    %13 = vector.load %arg4[%c0_7, %c0_8, %c0_9] : memref<3x128x128xbf16, #tpu.memory_space<vmem>>, vector<1x128x128xbf16>
    %14 = vector.shape_cast %13 : vector<1x128x128xbf16> to vector<128x128xbf16>
    %cst_10 = arith.constant dense<0.000000e+00> : vector<32x128xf32>
    %15 = tpu.matmul %12, %14, %cst_10 {dimension_numbers = #tpu.dot_dimension_numbers<[1], [0], [0], [1], [0, 0, 1, 1], [], []>} : vector<32x128xbf16>, vector<128x128xbf16>, vector<32x128xf32> -> vector<32x128xf32>
    %c0_11 = arith.constant 0 : index
    %c0_12 = arith.constant 0 : index
    %c0_13 = arith.constant 0 : index
    %16 = vector.load %arg5[%c0_11, %c0_12, %c0_13] : memref<3x1x128xf32, #tpu.memory_space<vmem>>, vector<1x1x128xf32>
    %17 = vector.shape_cast %16 : vector<1x1x128xf32> to vector<1x128xf32>
    %18 = vector.broadcast %17 : vector<1x128xf32> to vector<32x128xf32>
    %19 = arith.addf %15, %18 : vector<32x128xf32>
    %20 = arith.addf %19, %6 : vector<32x128xf32>
    %cst_14 = arith.constant 0.000000e+00 : f32
    %21 = vector.broadcast %cst_14 : f32 to vector<32x128xf32>
    %22 = arith.cmpf ogt, %20, %21 : vector<32x128xf32>
    %cst_15 = arith.constant 1.000000e-01 : f32
    %23 = vector.broadcast %cst_15 : f32 to vector<32x128xf32>
    %24 = arith.mulf %23, %20 : vector<32x128xf32>
    %25 = arith.select %22, %20, %24 : vector<32x128xi1>, vector<32x128xf32>
    %26 = arith.truncf %25 : vector<32x128xf32> to vector<32x128xbf16>
    %c1 = arith.constant 1 : index
    %c0_16 = arith.constant 0 : index
    %c0_17 = arith.constant 0 : index
    %27 = vector.load %arg4[%c1, %c0_16, %c0_17] : memref<3x128x128xbf16, #tpu.memory_space<vmem>>, vector<1x128x128xbf16>
    %28 = vector.shape_cast %27 : vector<1x128x128xbf16> to vector<128x128xbf16>
    %cst_18 = arith.constant dense<0.000000e+00> : vector<32x128xf32>
    %29 = tpu.matmul %26, %28, %cst_18 {dimension_numbers = #tpu.dot_dimension_numbers<[1], [0], [0], [1], [0, 0, 1, 1], [], []>} : vector<32x128xbf16>, vector<128x128xbf16>, vector<32x128xf32> -> vector<32x128xf32>
    %c1_19 = arith.constant 1 : index
    %c0_20 = arith.constant 0 : index
    %c0_21 = arith.constant 0 : index
    %30 = vector.load %arg5[%c1_19, %c0_20, %c0_21] : memref<3x1x128xf32, #tpu.memory_space<vmem>>, vector<1x1x128xf32>
    %31 = vector.shape_cast %30 : vector<1x1x128xf32> to vector<1x128xf32>
    %32 = vector.broadcast %31 : vector<1x128xf32> to vector<32x128xf32>
    %33 = arith.addf %29, %32 : vector<32x128xf32>
    %34 = arith.addf %33, %20 : vector<32x128xf32>
    %cst_22 = arith.constant 0.000000e+00 : f32
    %35 = vector.broadcast %cst_22 : f32 to vector<32x128xf32>
    %36 = arith.cmpf ogt, %34, %35 : vector<32x128xf32>
    %cst_23 = arith.constant 1.000000e-01 : f32
    %37 = vector.broadcast %cst_23 : f32 to vector<32x128xf32>
    %38 = arith.mulf %37, %34 : vector<32x128xf32>
    %39 = arith.select %36, %34, %38 : vector<32x128xi1>, vector<32x128xf32>
    %40 = arith.truncf %39 : vector<32x128xf32> to vector<32x128xbf16>
    %c2 = arith.constant 2 : index
    %c0_24 = arith.constant 0 : index
    %c0_25 = arith.constant 0 : index
    %41 = vector.load %arg4[%c2, %c0_24, %c0_25] : memref<3x128x128xbf16, #tpu.memory_space<vmem>>, vector<1x128x128xbf16>
    %42 = vector.shape_cast %41 : vector<1x128x128xbf16> to vector<128x128xbf16>
    %cst_26 = arith.constant dense<0.000000e+00> : vector<32x128xf32>
    %43 = tpu.matmul %40, %42, %cst_26 {dimension_numbers = #tpu.dot_dimension_numbers<[1], [0], [0], [1], [0, 0, 1, 1], [], []>} : vector<32x128xbf16>, vector<128x128xbf16>, vector<32x128xf32> -> vector<32x128xf32>
    %c2_27 = arith.constant 2 : index
    %c0_28 = arith.constant 0 : index
    %c0_29 = arith.constant 0 : index
    %44 = vector.load %arg5[%c2_27, %c0_28, %c0_29] : memref<3x1x128xf32, #tpu.memory_space<vmem>>, vector<1x1x128xf32>
    %45 = vector.shape_cast %44 : vector<1x1x128xf32> to vector<1x128xf32>
    %46 = vector.broadcast %45 : vector<1x128xf32> to vector<32x128xf32>
    %47 = arith.addf %43, %46 : vector<32x128xf32>
    %48 = arith.addf %47, %34 : vector<32x128xf32>
    %49 = vector.extract_strided_slice %48 {offsets = [0, 0], sizes = [32, 64], strides = [1, 1]} : vector<32x128xf32> to vector<32x64xf32>
    %c0_30 = arith.constant 0 : index
    %c0_31 = arith.constant 0 : index
    %50 = vector.load %arg6[%c0_30, %c0_31] : memref<32x64xf32, #tpu.memory_space<vmem>>, vector<32x64xf32>
    tpu.vector_store %arg6[%c0_30, %c0_31], %49 {strides = array<i32>} : memref<32x64xf32, #tpu.memory_space<vmem>>, vector<32x64xf32>,
    return
  }
  func.func @transform_0(%arg0: i32) -> (i32, i32) {
    %c0_i32 = arith.constant 0 : i32
    %c0_i32_0 = arith.constant 0 : i32
    return %arg0, %c0_i32 : i32, i32
  }
  func.func @transform_1(%arg0: i32) -> (i32, i32) {
    %c0_i32 = arith.constant 0 : i32
    %c0_i32_0 = arith.constant 0 : i32
    %c0_i32_1 = arith.constant 0 : i32
    return %c0_i32, %c0_i32_0 : i32, i32
  }
  func.func @transform_2(%arg0: i32) -> (i32, i32) {
    %c0_i32 = arith.constant 0 : i32
    %c0_i32_0 = arith.constant 0 : i32
    %c0_i32_1 = arith.constant 0 : i32
    return %c0_i32, %c0_i32_0 : i32, i32
  }
  func.func @transform_3(%arg0: i32) -> (i32, i32, i32) {
    %c0_i32 = arith.constant 0 : i32
    %c0_i32_0 = arith.constant 0 : i32
    %c0_i32_1 = arith.constant 0 : i32
    %c0_i32_2 = arith.constant 0 : i32
    return %c0_i32, %c0_i32_0, %c0_i32_1 : i32, i32, i32
  }
  func.func @transform_4(%arg0: i32) -> (i32, i32, i32) {
    %c0_i32 = arith.constant 0 : i32
    %c0_i32_0 = arith.constant 0 : i32
    %c0_i32_1 = arith.constant 0 : i32
    %c0_i32_2 = arith.constant 0 : i32
    return %c0_i32, %c0_i32_0, %c0_i32_1 : i32, i32, i32
  }
  func.func @transform_5(%arg0: i32) -> (i32, i32) {
    %c0_i32 = arith.constant 0 : i32
    %c0_i32_0 = arith.constant 0 : i32
    return %arg0, %c0_i32 : i32, i32
  }
}

</mosaic_0001>

<bundles_post_ra>
// kernel: tpu_custom_call.1
= control target key start
LH: loop header
LB: loop body
LE: loop exit
PB: predicated region body
PF: predicated region fallthrough
CT: control target
= control target key end

     0   :  { %10 = vsyncpa [#allocation3], 0  ;;  %s1253_s0 = inlined_call_operand.vmem [shape: f32[40,32], index: 0, kind: input, shape index: {}]   ;;  %s1254_s1 = inlined_call_operand.vmem [shape: bf16[32,128], index: 1, kind: input, shape index: {}]   ;;  %s1255_s2 = inlined_call_operand.vmem [shape: f32[1,128], index: 2, kind: input, shape index: {}]   ;;  %s1256_s3 = inlined_call_operand.hbm [shape: bf16[3,128,128], index: 3, kind: input, shape index: {}]   ;;  %s1257_s4 = inlined_call_operand.vmem [shape: f32[3,1,128], index: 4, kind: input, shape index: {}]   ;;  %s1258_s5 = inlined_call_operand.hbm [shape: f32[40,64], index: 5, kind: output, shape index: {}]  }
   0x1   :  { %11 = vsyncpa [#allocation4], 0 }
   0x2   :  { %13 = vsyncpa [#allocation4 + $0x1], 0  ;;  %s1104_s18 = smov 0   ;;  %s1106_s19 = smov 0  }
   0x3   :  { %s1108_s20 = smov 0   ;;  %s1110_s21 = smov 0  }
   0x4 LB: > { %s1125_s22 = sadd.s32 4294967295, %s1066_s21   ;;  %s741_s23 = sadd.s32 4294967294, %s1066_s21   ;;  %s1066_s21 = sphi %s1110_s21, %s1265_s21   ;;  %s1062_s20 = sphi %s1108_s20, %s1264_s20   ;;  %s1058_s19 = sphi %s1106_s19, %s1263_s19   ;;  %s1054_s18 = sphi %s1104_s18, %s1262_s18  }
   0x5   : > { %s1129_s24 = sadd.s32 1, %s1066_s21   ;;  %s136_s25 = sadd.s32 1, %s1062_s20 }
   0x6   : > { %s133_s26 = ssub.s32 %s1066_s21, %s1129_s24  ;;  %p146_p0 = scmp.ne.s32.totalorder %s1062_s20, %s1058_s19 }
   0x7   : > { %p134_p1 = scmp.eq.s32.totalorder %s133_s26, 0  ;;  %p147_p2 = scmp.eq.s32.totalorder %s1125_s22, 1 }
   0x8   : > { %p152_p3 = scmp.ne.s32.totalorder %s1058_s19, %s1054_s18  ;;  %p153_p4 = scmp.eq.s32.totalorder %s741_s23, 1 }
   0x9   : > { %s1140_s27 = scalar_select %p134_p1, %s1062_s20, %s136_s25  }
   0xa   : > { %p1142_p5 = por %p147_p2, %p146_p0  ;;  %p1146_p6 = por %p153_p4, %p152_p3 }
   0xb   : > { %p742_p7 = scmp.ge.s32.totalorder %s1066_s21, 1  ;;  %p160_p8 = scmp.lt.s32.totalorder %s1066_s21, 3 }
   0xc   : > { %p915_p9 = scmp.eq.s32.totalorder %s1125_s22, 0  ;;  %s177_s7 = sshll.u32 %s1256_s3, 4  ;;  %s178_s7 = int_to_ptr.hbm [resolvable:$true] %s177_s7 }
   0xd   : > { %p161_p10 = pnand %p742_p7, %p160_p8  ;;  %s1068_s8 = smov [#allocation2]  }
   0xe   : > { %s179_s9 = sshll.u32 %s1068_s8, 4  ;;  %s1069_s10 = smov 64   ;;  %s180_s9 = int_to_ptr.vmem [resolvable:$true] %s179_s9 }
   0xf   : > { %p907_p11 = pneg %p161_p10  ;;  %s1070_s11 = smov 4  }
  0x10   : > { %215 = sbr.rel (%p161_p10) target bundleno = 657 (0x291), region = 40 }
  0x11   : > { %p908_p12 = pnand %p915_p9, %p907_p11 }
  0x13   : > { %910 = dma.hbm_to_vmem [thread:$0]  (!%p908_p12), %s178_s7, 3072, %s180_s9, [#allocation3], %s1069_s10, %s1069_s10, %s1070_s11  }
  0x15   : > { %1045 = dma.done.wait (%p915_p9), [#allocation3], 3072  }
  0x16   : > { %1047 = vsyncadd (%p915_p9), [#allocation3], 4294964224  ;;  %s1163_s12 = sshll.u32 %s1125_s22, 2  ;;  %v868_v0 = vld [vmem:[%s1254_s1 + $0x8] sm:$0xff]  ;;  %v867_v1 = vld [vmem:[%s1254_s1] sm:$0xff]  ;;  %vm294_vm0 = vcmask 261120  }
  0x17   : > { %p253_p13 = scmp.lt.s32.totalorder %s1163_s12, 4  ;;  %307 = vmatpush.bf16.msra.mxu0 %v868_v0  ;;  %v876_v4 = vld [vmem:[#allocation2 + $0x38] sm:$0xff]  ;;  %v875_v6 = vld [vmem:[#allocation2 + $0x30] sm:$0xff]  ;;  %v874_v7 = vld [vmem:[#allocation2 + $0x28] sm:$0xff]  ;;  %vm639_vm13 = vcmask 523264   ;;  %s653_s25 = ssub.s32 (%p1142_p5), 5, %s1163_s12 }
  0x18   : > { %894 = vmatpush.bf16.msra.mxu1 %v876_v4  ;;  %v873_v8 = vld [vmem:[#allocation2 + $0x20] sm:$0xff]  ;;  %v872_v12 = vld [vmem:[#allocation2 + $0x18] sm:$0xff]  ;;  %v871_v13 = vld [vmem:[#allocation2 + $0x10] sm:$0xff]  ;;  %p654_p0 = scmp.lt.s32.totalorder (%p1142_p5), %s653_s25, 4 }
  0x19   : > { %s254_s13 = scalar_select %p253_p13, %s1163_s12, 4  ;;  %v870_v14 = vld [vmem:[#allocation2 + $0x8] sm:$0xff]  ;;  %v869_v15 = vld [vmem:[#allocation2] sm:$0xff]  ;;  %v884_v17 = vld [vmem:[#allocation2 + $0x78] sm:$0xff] }
  0x1a   : > { %v955_v18 = vld [vmem:[%s1255_s2] ss:$0 sm:$0xff]  ;;  %509 = vmatpush.bf16.msra.mxu2 %v884_v17  ;;  %v883_v19 = vld [vmem:[#allocation2 + $0x70] sm:$0xff]  ;;  %v882_v21 = vld [vmem:[#allocation2 + $0x68] sm:$0xff] }
  0x1b   : > { %s749_s14 = sshll.u32 %s254_s13, 3  ;;  %308 = vmatpush.bf16.msra.mxu0 %v867_v1  ;;  %v881_v25 = vld [vmem:[#allocation2 + $0x60] sm:$0xff]  ;;  %v880_v39 = vld [vmem:[#allocation2 + $0x58] sm:$0xff]  ;;  %v879_v40 = vld [vmem:[#allocation2 + $0x50] sm:$0xff]  ;;  %s245_s13 = sand.u32 1, %s1058_s19  }
  0x1c   : > { %s256_s17 = scalar_lea.vmem %s1253_s0, %s749_s14  ;;  %895 = vmatpush.bf16.msra.mxu1 %v875_v6  ;;  %v878_v41 = vld [vmem:[#allocation2 + $0x48] sm:$0xff]  ;;  %v877_v42 = vld [vmem:[#allocation2 + $0x40] sm:$0xff]  ;;  %v892_v45 = vld [vmem:[#allocation2 + $0xb8] sm:$0xff]  ;;  %s747_s16 = sshll.u32 %s245_s13, 5 }
  0x1d   : > { %v268_v2 = vld [vmem:[%s256_s17] sm:$0xff]  ;;  %v269_v3 = vld [vmem:[%s256_s17 + $0x8] sm:$0xff]  ;;  %v270_v9 = vld [vmem:[%s256_s17 + $0x10] sm:$0xff]  ;;  %616 = vmatpush.bf16.msra.mxu3 %v892_v45  ;;  %s1193_s23 = scalar_lea.sflag [#allocation4], %s245_s13 }
  0x1e   : > { %v272_v5 = vpack.c.bf16 %v269_v3, %v268_v2  ;;  %v271_v10 = vld [vmem:[%s256_s17 + $0x18] sm:$0xff]  ;;  %510 = vmatpush.bf16.msra.mxu2 %v883_v19  ;;  %v956_v43 = vld [vmem:[%s1257_s4] ss:$0 sm:$0xff]  ;;  %v891_v47 = vld [vmem:[#allocation2 + $0xb0] sm:$0xff]  ;;  %s247_s17 = scalar_lea.vmem [#allocation5], %s747_s16 }
  0x1f   : > { %402 = vmatpush.bf16.msrb.mxu0 %v876_v4  ;;  %v273_v11 = vpack.c.bf16 %v271_v10, %v270_v9  ;;  %v890_v50 = vld [vmem:[#allocation2 + $0xa8] sm:$0xff]  ;;  %v889_v54 = vld [vmem:[#allocation2 + $0xa0] sm:$0xff] }
  0x20   : > { %758 = vmatmul.msk.bf16.vlgmr.msra.gmra.mxu0 %vm294_vm0, %v272_v5  ;;  %896 = vmatpush.bf16.msra.mxu1 %v874_v7  ;;  %v885_v9 = vld [vmem:[#allocation2 + $0x80] sm:$0xff] }
  0x21   : > { %617 = vmatpush.bf16.msra.mxu3 %v891_v47  ;;  %v957_v10 = vld [vmem:[%s1257_s4 + $0x1] ss:$0 sm:$0xff] }
  0x22   : > { %511 = vmatpush.bf16.msra.mxu2 %v882_v21 }
  0x23   : > { %403 = vmatpush.bf16.msrb.mxu0 %v875_v6  ;;  %v888_v6 = vld [vmem:[#allocation2 + $0x98] sm:$0xff] }
  0x24   : > { %897 = vmatpush.bf16.msra.mxu1 %v873_v8 }
  0x25   : > { %618 = vmatpush.bf16.msra.mxu3 %v890_v50 }
  0x26   : > { %512 = vmatpush.bf16.msra.mxu2 %v881_v25 }
  0x27   : > { %404 = vmatpush.bf16.msrb.mxu0 %v874_v7  ;;  %v887_v7 = vld [vmem:[#allocation2 + $0x90] sm:$0xff] }
  0x28   : > { %898 = vmatpush.bf16.msra.mxu1 %v872_v12 }
  0x29   : > { %619 = vmatpush.bf16.msra.mxu3 %v889_v54 }
  0x2a   : > { %513 = vmatpush.bf16.msra.mxu2 %v880_v39 }
  0x2b   : > { %405 = vmatpush.bf16.msrb.mxu0 %v873_v8  ;;  %v886_v8 = vld [vmem:[#allocation2 + $0x88] sm:$0xff] }
  0x2c   : > { %899 = vmatpush.bf16.msra.mxu1 %v871_v13 }
  0x2d   : > { %620 = vmatpush.bf16.msra.mxu3 %v888_v6 }
  0x2e   : > { %514 = vmatpush.bf16.msra.mxu2 %v879_v40 }
  0x2f   : > { %406 = vmatpush.bf16.msrb.mxu0 %v872_v12 }
  0x30   : > { %759 = vmatmul.msk.bf16.gmra.mxu0 %vm294_vm0, %v273_v11  ;;  %900 = vmatpush.bf16.msra.mxu1 %v870_v14 }
  0x31   : > { %621 = vmatpush.bf16.msra.mxu3 %v887_v7 }
  0x32   : > { %515 = vmatpush.bf16.msra.mxu2 %v878_v41 }
  0x33   : > { %407 = vmatpush.bf16.msrb.mxu0 %v871_v13 }
  0x34   : > { %901 = vmatpush.bf16.msra.mxu1 %v869_v15 }
  0x35   : > { %622 = vmatpush.bf16.msra.mxu3 %v886_v8 }
  0x36   : > { %516 = vmatpush.bf16.msra.mxu2 %v877_v42 }
  0x37   : > { %408 = vmatpush.bf16.msrb.mxu0 %v870_v14 }
  0x39   : > { %623 = vmatpush.bf16.msra.mxu3 %v885_v9 }
  0x3b   : > { %409 = vmatpush.bf16.msrb.mxu0 %v869_v15 }
  0x9d   : > { %v310_v16 = vpop.f32.mrf.mxu0 }
  0x9e   : > { %v311_v20 = vadd.f32 %v955_v18, %v310_v16 }
  0xa0   : > { %v324_v23 = vmul.f32 0.1, %v311_v20  ;;  %vm320_vm1 = vcmp.gt.f32.partialorder %v311_v20, 0.0 }
  0xa2   : > { %v328_v27 = vsel %vm320_vm1, %v311_v20, %v324_v23 }
  0xa5   : > { %v312_v22 = vpop.f32.mrf.mxu0 }
  0xa6   : > { %v313_v24 = vadd.f32 %v955_v18, %v312_v22 }
  0xa8   : > { %v325_v26 = vmul.f32 0.1, %v313_v24  ;;  %vm321_vm2 = vcmp.gt.f32.partialorder %v313_v24, 0.0 }
  0xaa   : > { %v329_v28 = vsel %vm321_vm2, %v313_v24, %v325_v26 }
  0xab   : > { %v332_v29 = vpack.c.bf16 %v329_v28, %v328_v27 }
  0xad   : > { %v315_v30 = vpop.f32.mrf.mxu0  ;;  %410 = vmatmul.bf16.vlgmr.msrb.gmra.mxu0 %v332_v29 }
  0xae   : > { %v316_v31 = vadd.f32 %v955_v18, %v315_v30 }
  0xb0   : > { %v326_v34 = vmul.f32 0.1, %v316_v31  ;;  %vm322_vm3 = vcmp.gt.f32.partialorder %v316_v31, 0.0 }
  0xb2   : > { %v330_v36 = vsel %vm322_vm3, %v316_v31, %v326_v34 }
  0xb5   : > { %v317_v32 = vpop.f32.mrf.mxu0 }
  0xb6   : > { %v318_v33 = vadd.f32 %v955_v18, %v317_v32 }
  0xb8   : > { %vm323_vm4 = vcmp.gt.f32.partialorder %v318_v33, 0.0  ;;  %v327_v35 = vmul.f32 0.1, %v318_v33 }
  0xba   : > { %v331_v37 = vsel %vm323_vm4, %v318_v33, %v327_v35 }
  0xbb   : > { %v333_v38 = vpack.c.bf16 %v331_v37, %v330_v36 }
  0xbd   : > { %415 = vmatmul.bf16.vlgmr.msra.gmra.mxu1 %v333_v38 }
 0x12a   : > { %v411_v44 = vpop.f32.mrf.mxu0 }
 0x12b   : > { %v412_v46 = vadd.f32 %v956_v43, %v411_v44 }
 0x12d   : > { %v421_v48 = vadd.f32 %v412_v46, %v311_v20 }
 0x12f   : > { %v429_v53 = vmul.f32 0.1, %v421_v48  ;;  %vm425_vm5 = vcmp.gt.f32.partialorder %v421_v48, 0.0 }
 0x131   : > { %v433_v56 = vsel %vm425_vm5, %v421_v48, %v429_v53 }
 0x132   : > { %v413_v49 = vpop.f32.mrf.mxu0 }
 0x133   : > { %v414_v51 = vadd.f32 %v956_v43, %v413_v49 }
 0x135   : > { %v422_v52 = vadd.f32 %v414_v51, %v313_v24 }
 0x137   : > { %vm426_vm6 = vcmp.gt.f32.partialorder %v422_v52, 0.0  ;;  %v430_v55 = vmul.f32 0.1, %v422_v52 }
 0x139   : > { %v434_v57 = vsel %vm426_vm6, %v422_v52, %v430_v55 }
 0x13a   : > { %v416_v58 = vpop.f32.mrf.mxu1  ;;  %v437_v59 = vpack.c.bf16 %v434_v57, %v433_v56 }
 0x13b   : > { %v417_v60 = vadd.f32 %v956_v43, %v416_v58 }
 0x13c   : > { %517 = vmatmul.bf16.vlgmr.msra.gmra.mxu2 %v437_v59 }
 0x13d   : > { %v423_v61 = vadd.f32 %v417_v60, %v316_v31 }
 0x13f   : > { %v431_v1 = vmul.f32 0.1, %v423_v61  ;;  %vm427_vm7 = vcmp.gt.f32.partialorder %v423_v61, 0.0 }
 0x141   : > { %v435_v3 = vsel %vm427_vm7, %v423_v61, %v431_v1 }
 0x142   : > { %v418_v62 = vpop.f32.mrf.mxu1 }
 0x143   : > { %v419_v63 = vadd.f32 %v956_v43, %v418_v62 }
 0x145   : > { %v424_v0 = vadd.f32 %v419_v63, %v318_v33  ;;  %v958_v33 = vld [vmem:[%s1257_s4 + $0x2] ss:$0 sm:$0xff] }
 0x147   : > { %vm428_vm8 = vcmp.gt.f32.partialorder %v424_v0, 0.0  ;;  %v432_v2 = vmul.f32 0.1, %v424_v0 }
 0x149   : > { %v436_v4 = vsel %vm428_vm8, %v424_v0, %v432_v2 }
 0x14a   : > { %v438_v5 = vpack.c.bf16 %v436_v4, %v435_v3 }
 0x14c   : > { %522 = vmatmul.bf16.gmra.mxu2 %v438_v5 }
 0x1bf   : > { %v518_v11 = vpop.f32.mrf.mxu2 }
 0x1c0   : > { %v519_v12 = vadd.f32 %v957_v10, %v518_v11 }
 0x1c2   : > { %v528_v13 = vadd.f32 %v519_v12, %v421_v48 }
 0x1c4   : > { %v536_v17 = vmul.f32 0.1, %v528_v13  ;;  %vm532_vm9 = vcmp.gt.f32.partialorder %v528_v13, 0.0 }
 0x1c6   : > { %v540_v19 = vsel %vm532_vm9, %v528_v13, %v536_v17 }
 0x1c7   : > { %v520_v14 = vpop.f32.mrf.mxu2 }
 0x1c8   : > { %v521_v15 = vadd.f32 %v957_v10, %v520_v14 }
 0x1ca   : > { %v529_v16 = vadd.f32 %v521_v15, %v422_v52 }
 0x1cc   : > { %vm533_vm10 = vcmp.gt.f32.partialorder %v529_v16, 0.0  ;;  %v537_v18 = vmul.f32 0.1, %v529_v16 }
 0x1ce   : > { %v541_v20 = vsel %vm533_vm10, %v529_v16, %v537_v18 }
 0x1cf   : > { %v523_v21 = vpop.f32.mrf.mxu2  ;;  %v544_v22 = vpack.c.bf16 %v541_v20, %v540_v19 }
 0x1d0   : > { %v524_v23 = vadd.f32 %v957_v10, %v523_v21 }
 0x1d1   : > { %624 = vmatmul.bf16.vlgmr.msra.gmra.mxu3 %v544_v22 }
 0x1d2   : > { %v530_v24 = vadd.f32 %v524_v23, %v423_v61 }
 0x1d4   : > { %v538_v28 = vmul.f32 0.1, %v530_v24  ;;  %vm534_vm11 = vcmp.gt.f32.partialorder %v530_v24, 0.0 }
 0x1d6   : > { %v542_v30 = vsel %vm534_vm11, %v530_v24, %v538_v28 }
 0x1d7   : > { %v525_v25 = vpop.f32.mrf.mxu2 }
 0x1d8   : > { %v526_v26 = vadd.f32 %v957_v10, %v525_v25 }
 0x1da   : > { %v531_v27 = vadd.f32 %v526_v26, %v424_v0 }
 0x1dc   : > { %vm535_vm12 = vcmp.gt.f32.partialorder %v531_v27, 0.0  ;;  %v539_v29 = vmul.f32 0.1, %v531_v27 }
 0x1de   : > { %v543_v31 = vsel %vm535_vm12, %v531_v27, %v539_v29 }
 0x1df   : > { %v545_v32 = vpack.c.bf16 %v543_v31, %v542_v30 }
 0x1e1   : > { %629 = vmatmul.bf16.gmra.mxu3 %v545_v32 }
 0x254   : > { %v625_v34 = vpop.f32.mrf.mxu3 }
 0x255   : > { %v626_v35 = vadd.f32 %v958_v33, %v625_v34 }
 0x257   : > { %v635_v36 = vadd.f32 %v626_v35, %v528_v13 }
 0x259   : > { %640 = vst.msk [vmem:[%s247_s17] sm:$0xff] %vm639_vm13, %v635_v36 }
 0x25c   : > { %v627_v37 = vpop.f32.mrf.mxu3 }
 0x25d   : > { %v628_v38 = vadd.f32 %v958_v33, %v627_v37 }
 0x25f   : > { %v636_v39 = vadd.f32 %v628_v38, %v529_v16 }
 0x261   : > { %641 = vst.msk [vmem:[%s247_s17 + $0x8] sm:$0xff] %vm639_vm13, %v636_v39 }
 0x264   : > { %v630_v40 = vpop.f32.mrf.mxu3 }
 0x265   : > { %v631_v41 = vadd.f32 %v958_v33, %v630_v40 }
 0x267   : > { %v637_v42 = vadd.f32 %v631_v41, %v530_v24 }
 0x269   : > { %642 = vst.msk [vmem:[%s247_s17 + $0x10] sm:$0xff] %vm639_vm13, %v637_v42 }
 0x26c   : > { %v632_v43 = vpop.f32.mrf.mxu3 }
 0x26d   : > { %v633_v44 = vadd.f32 %v958_v33, %v632_v43  ;;  %651 = sbr.rel (!%p1142_p5) target bundleno = 657 (0x291), region = 48 }
 0x26f   : > { %v638_v45 = vadd.f32 %v633_v44, %v531_v27 }
 0x271   : > { %643 = vst.msk [vmem:[%s247_s17 + $0x18] sm:$0xff] %vm639_vm13, %v638_v45 }
 0x272   : > { %s1267_s25 = smov (!%p654_p0, %s653_s25), 4 }
 0x273   : > { %s860_s26 = sshll.u32 %s1267_s25, 3 }
 0x274   : > { %s657_s30 = ssub.s32 32, %s860_s26 }
 0x275   : > { %s658_s6 = sshll.u32 %s657_s30, 4 }
 0x276   : > { %659 = vsyncadd %s1193_s23, %s658_s6  ;;  %p1202_p1 = scmp.ne.s32.totalorder %s860_s26, 0  ;;  %s893_s28 = sshll.u32 %s1125_s22, 5 }
 0x277   : > { %s662_s12 = scalar_lea.hbm %s1258_s5, %s893_s28  ;;  %s664_s10 = sshll.u32 %s247_s17, 4  ;;  %s1210_s10 = int_to_ptr.vmem [resolvable:$true] %s664_s10 }
 0x278   : > { %s666_s11 = sshll.u32 %s662_s12, 4  ;;  %s864_s13 = sshll.u32 %s1267_s25, 7  ;;  %s1212_s11 = int_to_ptr.hbm [resolvable:$true] %s666_s11 }
 0x279   : > { %s989_s14 = sshra.s32 %s1210_s10, 4  ;;  %s991_s15 = sshrl.u32 %s864_s13, 4  ;;  %s990_s14 = int_to_ptr.vmem [resolvable:$true] %s989_s14 }
 0x27a   : > { %s996_s16 = scalar_lea.vmem %s990_s14, %s991_s15  ;;  %s1071_s22 = smov [#allocation5]  }
 0x27b   : > { %p997_p2 = scmp.ne.s32.totalorder %s990_s14, %s996_s16  ;;  %s1000_s26 = scalar_lea.vmem %s1071_s22, 64 }
 0x27c   : > { %p1002_p5 = scmp.lt.s32.totalorder %s1000_s26, %s996_s16 }
 0x27d   : > { %p998_p3 = pnand %p997_p2, %p1202_p1 }
 0x27f   : > { %p999_p4 = pneg %p998_p3 }
 0x281   : > { %p1004_p7 = pnand %p1002_p5, %p999_p4 }
 0x283   : > { %1007 = shalt.err (!%p1004_p7)
}
 0x284   : > { %s1008_s17 = sshra.s32 %s1212_s11, 4  ;;  %s1019_s8 = scalar_lea.hbm %s1258_s5, 40  ;;  %s1009_s17 = int_to_ptr.hbm [resolvable:$true] %s1008_s17 }
 0x285   : > { %s1015_s30 = scalar_lea.hbm %s1009_s17, %s991_s15  ;;  %p1020_p11 = scmp.lt.s32.totalorder %s1009_s17, %s1258_s5 }
 0x286   : > { %p1016_p8 = scmp.ne.s32.totalorder %s1009_s17, %s1015_s30  ;;  %p1021_p12 = scmp.lt.s32.totalorder %s1019_s8, %s1015_s30 }
 0x288   : > { %p1017_p9 = pnand %p1016_p8, %p1202_p1  ;;  %p1022_p13 = por %p1021_p12, %p1020_p11 }
 0x28a   : > { %p1018_p10 = pneg %p1017_p9 }
 0x28c   : > { %p1023_p0 = pnand %p1022_p13, %p1018_p10 }
 0x28e   : > { %1026 = shalt.err (!%p1023_p0)
}
 0x28f   : > { %s1072_s14 = smov 128   ;;  %s1073_s15 = smov 8  }
 0x290   : > { %672 = dma.vmem_to_hbm [thread:$0]  (%p1202_p1), %s1210_s10, %s864_s13, %s1212_s11, %s1193_s23, %s1072_s14, %s1072_s14, %s1073_s15  }
 0x291 PF: > { %p917_p2 = scmp.ge.s32.totalorder %s1066_s21, 2  ;;  %s681_s16 = sand.u32 1, %s1054_s18  }
 0x292   : > { %s682_s22 = scalar_lea.sflag [#allocation4], %s681_s16 }
 0x293   : > { %p912_p3 = pnand %p917_p2, %p1146_p6 }
 0x295   : > { %p913_p4 = pneg %p912_p3 }
 0x297   : > { %1049 = dma.done.wait (%p913_p4), %s682_s22, 512  }
 0x298   : > { %1051 = vsyncadd (%p913_p4), %s682_s22, 4294966784  ;;  %p16_p5 = scmp.ge.s32.totalorder %s1129_s24, 4   ;;  %s1262_s18 = smov %s1058_s19 }
 0x299   : > { %s1263_s19 = smov %s1062_s20  ;;  %s1264_s20 = smov %s1140_s27 }
 0x29a   : > { %s1265_s21 = smov %s1129_s24  ;;  %18 = sbr.rel (!%p16_p5) target bundleno = 4 (0x4), region = 84 }
 0x29f   :  { %688 = vsyncpa [#allocation3], 1 }
 0x2a0   :  { %690 = vsyncpa [#allocation3 + $0x1], 1 }
 0x2a1   :  { %691 = vsyncpa [#allocation4], 1 }
 0x2a2   :  { %693 = vsyncpa [#allocation4 + $0x1], 1 }

</bundles_post_ra>
